<compile_context>
chip_gen: v5e
topology: v5e:2x2
jax: 0.10.0
libtpu: 0.0.40
codegen_flags: <defaults>
</compile_context>

<pallas_src>
import functools

import jax
import jax.numpy as jnp
from jax.experimental import pallas as pl
from jax.experimental.pallas import tpu as pltpu


def _vmem_limit_bytes():
    try:
        cap = pltpu.get_tpu_info().vmem_capacity_bytes
    except Exception:
        cap = 64 * 1024 * 1024  # conservative (v7x per-TC) fallback
    return min(int(cap * 0.75), 100 * 1024 * 1024)


# --------------------- fused single-block fast path ---------------------

def _se_fused_kernel(x_ref, w1t_ref, b1_ref, w2t_ref, b2_ref, o_ref, *, inv_hw):
    # x_ref: (N, C, HW)  w1t: (C, Cr)  b1: (1, Cr)  w2t: (Cr, C)  b2: (1, C)
    # squeeze: global average pool over spatial lanes (f32 accumulation)
    pooled = jnp.sum(x_ref[...], axis=-1, dtype=jnp.float32) * inv_hw        # (N, C)
    # excitation: batched fc1 -> relu -> fc2 -> sigmoid
    h = jnp.dot(pooled, w1t_ref[...],
                preferred_element_type=jnp.float32) + b1_ref[...]            # (N, Cr)
    h = jnp.maximum(h, 0.0)
    s = jnp.dot(h, w2t_ref[...],
                preferred_element_type=jnp.float32) + b2_ref[...]            # (N, C)
    s = jax.nn.sigmoid(s)                                                    # f32
    # scale in f32, single cast at the store
    o_ref[...] = (x_ref[...].astype(jnp.float32) * s[:, :, None]).astype(o_ref.dtype)


# --------------------- tiled two-pass streaming path ---------------------

def _pool_kernel(x_ref, pooled_ref, *, hw):
    # x_ref: (1, C, tk)   pooled_ref: (1, C, 1) f32 accumulator (output-resident)
    k = pl.program_id(1)
    tk = x_ref.shape[-1]

    @pl.when(k == 0)
    def _():
        pooled_ref[...] = jnp.zeros_like(pooled_ref)

    x = x_ref[...].astype(jnp.float32)
    if hw % tk != 0:
        # ragged tail: zero the out-of-range lanes before summing
        lane = jax.lax.broadcasted_iota(jnp.int32, x.shape, 2) + k * tk
        x = jnp.where(lane < hw, x, 0.0)
    pooled_ref[...] += jnp.sum(x, axis=-1, keepdims=True)


def _excite_kernel(pooled_ref, w1t_ref, b1_ref, w2t_ref, b2_ref, gate_ref, *, inv_hw):
    # pooled_ref: (N, C) f32 sums  ->  gate_ref: (N, C) f32 sigmoid gate
    pooled = pooled_ref[...] * inv_hw
    h = jnp.dot(pooled, w1t_ref[...],
                preferred_element_type=jnp.float32) + b1_ref[...]
    h = jnp.maximum(h, 0.0)
    s = jnp.dot(h, w2t_ref[...],
                preferred_element_type=jnp.float32) + b2_ref[...]
    gate_ref[...] = jax.nn.sigmoid(s)


def _scale_kernel(x_ref, gate_ref, o_ref):
    # x_ref/o_ref: (1, C, tk)    gate_ref: (1, C, 1) f32 -> broadcast over lanes
    o_ref[...] = (x_ref[...].astype(jnp.float32) * gate_ref[...]).astype(o_ref.dtype)


# ------------------------------- wrapper -------------------------------

def se_block(x, w1, b1, w2, b2, *, tile_hw=None, force_tiled=False, donate_x=False):
    """SE_Block forward. x: (N, C, H, W). w1: (Cr, C), b1: (Cr,), w2: (C, Cr), b2: (C,)."""
    N, C, H, W = x.shape
    Cr = w1.shape[0]
    HW = H * W
    x_flat = x.reshape(N, C, HW)          # free metadata reshape

    # Pre-transpose FC weights to MXU-natural layout; biases as (1, ...) rows.
    w1t = jnp.transpose(w1).astype(jnp.float32)     # (C, Cr)
    w2t = jnp.transpose(w2).astype(jnp.float32)     # (Cr, C)
    b1_2d = b1.reshape(1, Cr).astype(jnp.float32)
    b2_2d = b2.reshape(1, C).astype(jnp.float32)

    vmem_limit = _vmem_limit_bytes()
    itemsize = x.dtype.itemsize
    aliases = {0: 0} if donate_x else {}

    # Fast path if x + out + one f32 temp comfortably fit scoped VMEM.
    fused_bytes = x_flat.size * (2 * itemsize + 4) + 4 * (C * Cr * 2 + C + Cr)
    use_fused = (not force_tiled) and fused_bytes <= int(0.6 * vmem_limit)

    if use_fused:
        out = pl.pallas_call(
            functools.partial(_se_fused_kernel, inv_hw=1.0 / HW),
            out_shape=jax.ShapeDtypeStruct((N, C, HW), x.dtype),
            in_specs=[pl.BlockSpec(memory_space=pltpu.MemorySpace.VMEM)] * 5,
            out_specs=pl.BlockSpec(memory_space=pltpu.MemorySpace.VMEM),
            input_output_aliases=aliases,
            compiler_params=pltpu.CompilerParams(vmem_limit_bytes=vmem_limit),
        )(x_flat, w1t, b1_2d, w2t, b2_2d)
        return out.reshape(N, C, H, W)

    # ---- tiled streaming path ----
    # Keep live VMEM (x tile + out tile, double-buffered) under ~min(28MiB, vmem/2)
    # -> sized for v7x's 64 MiB VMEM while still giving >=1024-lane tiles on v5e/v6e.
    tile_budget = min(28 * 1024 * 1024, vmem_limit // 2)
    if tile_hw is None:
        max_tk = max(128, (tile_budget // (4 * C * max(itemsize, 4)) // 128) * 128)
    else:
        max_tk = tile_hw
    if HW >= 128:
        tk = max(128, (min(max_tk, HW) // 128) * 128)
    else:
        tk = HW                     # full-extent block (allowed for tiny HW)
    kt = pl.cdiv(HW, tk)

    # pass 1: streaming pooled-sum reduction -> (N, C, 1) f32
    pooled = pl.pallas_call(
        functools.partial(_pool_kernel, hw=HW),
        out_shape=jax.ShapeDtypeStruct((N, C, 1), jnp.float32),
        grid=(N, kt),
        in_specs=[pl.BlockSpec((1, C, tk), lambda n, k: (n, 0, k))],
        out_specs=pl.BlockSpec((1, C, 1), lambda n, k: (n, 0, 0)),
        compiler_params=pltpu.CompilerParams(
            dimension_semantics=("parallel", "arbitrary"),
            vmem_limit_bytes=vmem_limit),
    )(x_flat)

    # pass 2: tiny excitation micro-kernel, batched over N (kept out of the streams)
    gate = pl.pallas_call(
        functools.partial(_excite_kernel, inv_hw=1.0 / HW),
        out_shape=jax.ShapeDtypeStruct((N, C), jnp.float32),
        in_specs=[pl.BlockSpec(memory_space=pltpu.MemorySpace.VMEM)] * 5,
        out_specs=pl.BlockSpec(memory_space=pltpu.MemorySpace.VMEM),
        compiler_params=pltpu.CompilerParams(vmem_limit_bytes=vmem_limit),
    )(pooled.reshape(N, C), w1t, b1_2d, w2t, b2_2d)

    # pass 3: streaming scale (pure vld -> vmul -> vst)
    out = pl.pallas_call(
        _scale_kernel,
        out_shape=jax.ShapeDtypeStruct((N, C, HW), x.dtype),
        grid=(N, kt),
        in_specs=[pl.BlockSpec((1, C, tk), lambda n, k: (n, 0, k)),
                  pl.BlockSpec((1, C, 1), lambda n, k: (n, 0, 0))],
        out_specs=pl.BlockSpec((1, C, tk), lambda n, k: (n, 0, k)),
        input_output_aliases=aliases,
        compiler_params=pltpu.CompilerParams(
            dimension_semantics=("parallel", "parallel"),
            vmem_limit_bytes=vmem_limit),
    )(x_flat, gate.reshape(N, C, 1))

    return out.reshape(N, C, H, W)


def se_block_ref(x, w1, b1, w2, b2):
    """Pure-JAX reference matching the PyTorch SE_Block forward."""
    pooled = jnp.mean(x, axis=(2, 3))                       # (N, C)
    h = jnp.maximum(pooled @ w1.T + b1, 0.0)                # (N, Cr)
    s = jax.nn.sigmoid(h @ w2.T + b2)                       # (N, C)
    return x * s[:, :, None, None]


if __name__ == "__main__":
    key = jax.random.PRNGKey(0)

    def make_params(k, C, reduction=8):
        Cr = max(1, C // reduction)
        k1, k2, k3, k4 = jax.random.split(k, 4)
        bound1 = 1.0 / (C ** 0.5)
        w1 = jax.random.uniform(k1, (Cr, C), jnp.float32, -bound1, bound1)
        b1 = jax.random.uniform(k2, (Cr,), jnp.float32, -bound1, bound1)
        bound2 = 1.0 / (Cr ** 0.5)
        w2 = jax.random.uniform(k3, (C, Cr), jnp.float32, -bound2, bound2)
        b2 = jax.random.uniform(k4, (C,), jnp.float32, -bound2, bound2)
        return w1, b1, w2, b2

    # 1) small shape -> fused single-block fast path
    kx, kp, key = jax.random.split(key, 3)
    x = jax.random.normal(kx, (2, 16, 16, 16), dtype=jnp.float32)
    w1, b1, w2, b2 = make_params(kp, 16)
    out = jax.block_until_ready(se_block(x, w1, b1, w2, b2))
    ref = se_block_ref(x, w1, b1, w2, b2)
    assert out.shape == ref.shape
    assert jnp.allclose(out, ref, atol=1e-5, rtol=1e-5), "fast path mismatch"

    # 2) ragged spatial size, still fast path (no wrapper-side pad/slice anymore)
    kx, kp, key = jax.random.split(key, 3)
    x = jax.random.normal(kx, (2, 16, 15, 17), dtype=jnp.float32)
    w1, b1, w2, b2 = make_params(kp, 16)
    out = jax.block_until_ready(se_block(x, w1, b1, w2, b2))
    ref = se_block_ref(x, w1, b1, w2, b2)
    assert jnp.allclose(out, ref, atol=1e-5, rtol=1e-5), "ragged fast path mismatch"

    # 3) force the tiled streaming path with a ragged HW tail (exercises the
    #    in-kernel edge mask, the accumulator grid, and the scale stream)
    kx, kp, key = jax.random.split(key, 3)
    x = jax.random.normal(kx, (2, 16, 20, 26), dtype=jnp.float32)   # HW = 520
    w1, b1, w2, b2 = make_params(kp, 16)
    out = jax.block_until_ready(
        se_block(x, w1, b1, w2, b2, force_tiled=True, tile_hw=128))
    ref = se_block_ref(x, w1, b1, w2, b2)
    assert jnp.allclose(out, ref, atol=1e-5, rtol=1e-5), "tiled path mismatch"

    print("KERNEL_OK")
</pallas_src>

<mosaic_0001>
module attributes {stable_mosaic.version = 11 : i64} {
  func.func @_se_fused_kernel(%arg0: memref<2x16x256xf32, #tpu.memory_space<vmem>>, %arg1: memref<16x2xf32, #tpu.memory_space<vmem>>, %arg2: memref<1x2xf32, #tpu.memory_space<vmem>>, %arg3: memref<2x16xf32, #tpu.memory_space<vmem>>, %arg4: memref<1x16xf32, #tpu.memory_space<vmem>>, %arg5: memref<2x16x256xf32, #tpu.memory_space<vmem>>) attributes {dimension_semantics = [], scalar_prefetch = 0 : i64, scratch_operands = 0 : i64, tpu.core_type = #tpu.core_type<tc>} {
    %c0 = arith.constant 0 : index
    %c0_0 = arith.constant 0 : index
    %c0_1 = arith.constant 0 : index
    %0 = vector.load %arg0[%c0, %c0_0, %c0_1] : memref<2x16x256xf32, #tpu.memory_space<vmem>>, vector<2x16x256xf32>
    %cst = arith.constant dense<0.000000e+00> : vector<2x16xf32>
    %1 = vector.multi_reduction <add>, %0, %cst [2] : vector<2x16x256xf32> to vector<2x16xf32>
    %cst_2 = arith.constant 3.906250e-03 : f32
    %2 = vector.broadcast %cst_2 : f32 to vector<2x16xf32>
    %3 = arith.mulf %1, %2 : vector<2x16xf32>
    %c0_3 = arith.constant 0 : index
    %c0_4 = arith.constant 0 : index
    %4 = vector.load %arg1[%c0_3, %c0_4] : memref<16x2xf32, #tpu.memory_space<vmem>>, vector<16x2xf32>
    %cst_5 = arith.constant dense<0.000000e+00> : vector<2x2xf32>
    %5 = tpu.matmul %3, %4, %cst_5 {dimension_numbers = #tpu.dot_dimension_numbers<[1], [0], [0], [1], [0, 0, 1, 1], [], []>} : vector<2x16xf32>, vector<16x2xf32>, vector<2x2xf32> -> vector<2x2xf32>
    %c0_6 = arith.constant 0 : index
    %c0_7 = arith.constant 0 : index
    %6 = vector.load %arg2[%c0_6, %c0_7] : memref<1x2xf32, #tpu.memory_space<vmem>>, vector<1x2xf32>
    %7 = vector.broadcast %6 : vector<1x2xf32> to vector<2x2xf32>
    %8 = arith.addf %5, %7 : vector<2x2xf32>
    %cst_8 = arith.constant 0.000000e+00 : f32
    %9 = vector.broadcast %cst_8 : f32 to vector<2x2xf32>
    %10 = arith.maximumf %8, %9 : vector<2x2xf32>
    %c0_9 = arith.constant 0 : index
    %c0_10 = arith.constant 0 : index
    %11 = vector.load %arg3[%c0_9, %c0_10] : memref<2x16xf32, #tpu.memory_space<vmem>>, vector<2x16xf32>
    %cst_11 = arith.constant dense<0.000000e+00> : vector<2x16xf32>
    %12 = tpu.matmul %10, %11, %cst_11 {dimension_numbers = #tpu.dot_dimension_numbers<[1], [0], [0], [1], [0, 0, 1, 1], [], []>} : vector<2x2xf32>, vector<2x16xf32>, vector<2x16xf32> -> vector<2x16xf32>
    %c0_12 = arith.constant 0 : index
    %c0_13 = arith.constant 0 : index
    %13 = vector.load %arg4[%c0_12, %c0_13] : memref<1x16xf32, #tpu.memory_space<vmem>>, vector<1x16xf32>
    %14 = vector.broadcast %13 : vector<1x16xf32> to vector<2x16xf32>
    %15 = arith.addf %12, %14 : vector<2x16xf32>
    %16 = arith.negf %15 : vector<2x16xf32>
    %17 = math.exp %16 : vector<2x16xf32>
    %cst_14 = arith.constant 1.000000e+00 : f32
    %18 = vector.broadcast %cst_14 : f32 to vector<2x16xf32>
    %19 = arith.addf %18, %17 : vector<2x16xf32>
    %20 = arith.divf %18, %19 : vector<2x16xf32>
    %c0_15 = arith.constant 0 : index
    %c0_16 = arith.constant 0 : index
    %c0_17 = arith.constant 0 : index
    %21 = vector.load %arg0[%c0_15, %c0_16, %c0_17] : memref<2x16x256xf32, #tpu.memory_space<vmem>>, vector<2x16x256xf32>
    %22 = vector.shape_cast %20 : vector<2x16xf32> to vector<2x16x1xf32>
    %23 = vector.broadcast %22 : vector<2x16x1xf32> to vector<2x16x256xf32>
    %24 = arith.mulf %21, %23 : vector<2x16x256xf32>
    %c0_18 = arith.constant 0 : index
    %c0_19 = arith.constant 0 : index
    %c0_20 = arith.constant 0 : index
    %25 = vector.load %arg5[%c0_18, %c0_19, %c0_20] : memref<2x16x256xf32, #tpu.memory_space<vmem>>, vector<2x16x256xf32>
    tpu.vector_store %arg5[%c0_18, %c0_19, %c0_20], %24 {strides = array<i32>} : memref<2x16x256xf32, #tpu.memory_space<vmem>>, vector<2x16x256xf32>,
    return
  }
}

</mosaic_0001>

<bundles_post_ra>
// kernel: tpu_custom_call.1
= control target key start
LH: loop header
LB: loop body
LE: loop exit
PB: predicated region body
PF: predicated region fallthrough
CT: control target
= control target key end

     0   :  { %10 = vsyncpa [#allocation3], 0  ;;  %s384_s0 = inlined_call_operand.hbm [shape: f32[2,16,256], index: 0, kind: input, shape index: {}]   ;;  %s385_s1 = inlined_call_operand.vmem [shape: f32[16,2], index: 1, kind: input, shape index: {}]   ;;  %s386_s2 = inlined_call_operand.vmem [shape: f32[1,2], index: 2, kind: input, shape index: {}]   ;;  %s387_s3 = inlined_call_operand.vmem [shape: f32[2,16], index: 3, kind: input, shape index: {}]   ;;  %s388_s4 = inlined_call_operand.vmem [shape: f32[1,16], index: 4, kind: input, shape index: {}]   ;;  %s389_s5 = inlined_call_operand.hbm [shape: f32[2,16,256], index: 5, kind: output, shape index: {}]  }
   0x1   :  { %11 = vsyncpa [#allocation4], 0  ;;  %s16_s20 = sshll.u32 %s384_s0, 4  ;;  %s291_s21 = smov [#allocation2]   ;;  %s17_s20 = int_to_ptr.hbm [resolvable:$true] %s16_s20 }
   0x2   :  { %s18_s22 = sshll.u32 %s291_s21, 4  ;;  %s292_s23 = smov 256   ;;  %s19_s22 = int_to_ptr.vmem [resolvable:$true] %s18_s22 }
   0x3   :  { %s293_s24 = smov 16  }
   0x4   :  { %24 = dma.hbm_to_vmem [thread:$0]  %s17_s20, 1024, %s19_s22, [#allocation3], %s292_s23, %s292_s23, %s293_s24  }
   0x5   :  { %287 = dma.done.wait [#allocation3], 1024  }
   0x6   :  { %288 = vsyncadd [#allocation3], 4294966272  ;;  %v331_v0 = vld [vmem:[#allocation2 + $0x20] sm:$0xff]  ;;  %v333_v1 = vld [vmem:[#allocation2 + $0x28] sm:$0xff]  ;;  %v71_v15 = vlaneseq  ;;  %vm76_vm0 = vcmask 130112   ;;  %vm81_vm1 = vcmask 1041409  }
   0x7   :  { %v335_v2 = vld [vmem:[#allocation2] sm:$0xff]  ;;  %v51_v3 = vadd.f32 %v333_v1, %v331_v0  ;;  %v339_v4 = vld [vmem:[#allocation2 + $0x8] sm:$0xff]  ;;  %v343_v6 = vld [vmem:[#allocation2 + $0x30] sm:$0xff]  ;;  %vm83_vm2 = vcmask 130048   ;;  %vm116_vm3 = vcmask 1041408   ;;  %vm112_vm4 = vcmask 15360  }
   0x8   :  { %v45_v5 = vadd.f32 %v339_v4, %v335_v2  ;;  %v345_v7 = vld [vmem:[#allocation2 + $0x38] sm:$0xff]  ;;  %v347_v8 = vld [vmem:[#allocation2 + $0x10] sm:$0xff]  ;;  %v62_v12 = vld [vmem:[%s385_s1 + $0x8] sm:$0xff]  ;;  %v72_v17 = vand.u32 127, %v71_v15  ;;  %v161_v37 = vshrl.u32 %v71_v15, 7  ;;  %s207_s9 = sshll.u32 %s389_s5, 4  ;;  %s208_s9 = int_to_ptr.hbm [resolvable:$true] %s207_s9 }
   0x9   :  { %52 = vadd.xlane.f32.xlu1 %v51_v3  ;;  %v349_v9 = vld [vmem:[#allocation2 + $0x18] sm:$0xff]  ;;  %v54_v10 = vadd.f32 %v345_v7, %v343_v6  ;;  %v61_v13 = vld [vmem:[%s385_s1] sm:$0xff]  ;;  %100 = vmatpush.msra.mxu0 %v62_v12 }
   0xa   :  { %46 = vadd.xlane.f32.xlu0 %v45_v5  ;;  %v48_v11 = vadd.f32 %v349_v9, %v347_v8  ;;  %v74_v19 = vadd.s32 4294967288, %v72_v17  ;;  %v107_v32 = vld [vmem:[%s387_s3] sm:$0x3]  ;;  %228 = vset.pattern.permute.xlu2 %v161_v37  ;;  %v168_v38 = vadd.s32 8, %v161_v37 }
   0xb   :  { %101 = vmatpush.msra.mxu0 %v61_v13  ;;  %221 = vmatpush.msk.msra.mxu1 %vm116_vm3, %v107_v32  ;;  %v233_v33 = vld [vmem:[%s386_s2] ss:$0 sm:$0xff]  ;;  %s294_s2 = smov [#allocation5]  }
   0xc   :  { %230 = vset.pattern.permute.xlu0 %v161_v37  ;;  %231 = vset.pattern.permute.xlu1 %v168_v38  ;;  %v234_v39 = vld [vmem:[%s388_s4] ss:$0 sm:$0xff]  ;;  %s205_s3 = sshll.u32 %s294_s2, 4  ;;  %s206_s3 = int_to_ptr.vmem [resolvable:$true] %s205_s3 }
  0x11   :  { %55 = vadd.xlane.f32.xlu1 %v54_v10 }
  0x12   :  { %49 = vadd.xlane.f32.xlu0 %v48_v11 }
  0x7c   :  { %v53_v14 = vpop.xlane.xlu1 %52 }
  0x7d   :  { %v47_v16 = vpop.xlane.xlu0 %46  ;;  %v59_v18 = vmul.f32 0.00390625, %v53_v14 }
  0x7e   :  { %v57_v20 = vmul.f32 0.00390625, %v47_v16 }
  0x7f   :  { %v78_v25 = vperm.slane %v59_v18, %v72_v17 }
  0x80   :  { %v73_v27 = vperm.slane %v57_v20, %v72_v17 }
  0x84   :  { %v56_v21 = vpop.xlane.xlu1 %55 }
  0x85   :  { %v60_v22 = vmul.f32 0.00390625, %v56_v21  ;;  %v50_v23 = vpop.xlane.xlu0 %49 }
  0x86   :  { %v58_v24 = vmul.f32 0.00390625, %v50_v23 }
  0x87   :  { %v79_v26 = vperm.slane %v60_v22, %v74_v19 }
  0x88   :  { %v75_v28 = vperm.slane %v58_v24, %v74_v19 }
  0x89   :  { %v80_v29 = vsel %vm76_vm0, %v79_v26, %v78_v25 }
  0x8a   :  { %v77_v30 = vsel %vm76_vm0, %v75_v28, %v73_v27 }
  0x8b   :  { %v82_v31 = vsel %vm81_vm1, %v80_v29, %v77_v30 }
  0x8c   :  { %220 = vmatmul.msk.f32.vlgmr.msra.gmra.mxu0 %vm83_vm2, %v82_v31 }
 0x109   :  { %v103_v34 = vpop.f32.mrf.mxu0 }
 0x10a   :  { %v104_v35 = vadd.f32 %v233_v33, %v103_v34 }
 0x10c   :  { %v106_v36 = vmax.f32 %v104_v35, 0.0 }
 0x10e   :  { %222 = vmatmul.msk.f32.vlgmr.msra.gmra.mxu1 %vm112_vm4, %v106_v36 }
 0x18b   :  { %v137_v40 = vpop.f32.mrf.mxu1 }
 0x18c   :  { %v138_v41 = vadd.f32 %v234_v39, %v137_v40 }
 0x18e   :  { %v223_v42 = vmul.f32 -1.442695, %v138_v41 }
 0x190   :  { %235 = vpow2.f32 %v223_v42 }
 0x196   :  { %v236_v43 = vpop.eup %235 }
 0x197   :  { %v143_v44 = vadd.f32 1.0, %v236_v43 }
 0x199   :  { %237 = vrcp.f32 %v143_v44  ;;  %v155_v48 = vand.u32 2147483648, %v143_v44  ;;  %v153_v50 = vand.u32 2147483647, %v143_v44  ;;  %vm149_vm6 = vweird.f32 %v143_v44 }
 0x19b   :  { %v156_v52 = vor.u32 1.1754944e-38, %v155_v48  ;;  %vm154_vm8 = vcmp.eq.f32.partialorder %v153_v50, 8.507059e+37 }
 0x19f   :  { %v238_v45 = vpop.eup %237 }
 0x1a0   :  { %v145_v46 = vmul.f32 %v238_v45, %v143_v44  ;;  %vm150_vm5 = vweird.f32 %v238_v45 }
 0x1a1   :  { %vm151_vm7 = vmor %vm149_vm6, %vm150_vm5 }
 0x1a2   :  { %v146_v47 = vsub.f32 1.0, %v145_v46 }
 0x1a4   :  { %v147_v49 = vmul.f32 %v238_v45, %v146_v47 }
 0x1a6   :  { %v148_v51 = vadd.f32 %v238_v45, %v147_v49 }
 0x1a8   :  { %v152_v53 = vsel %vm151_vm7, %v238_v45, %v148_v51 }
 0x1a9   :  { %v157_v54 = vsel %vm154_vm8, %v156_v52, %v152_v53 }
 0x1aa   :  { %v172_v55 = vperm.slane %v157_v54, 1  ;;  %v159_v56 = vperm.slane %v157_v54, 0 }
 0x1ac   :  { %183 = vperm.xlu1 %231, %v172_v55   ;;  %177 = vperm.xlu0 %230, %v172_v55  }
 0x1ad   :  { %164 = vperm.xlu2 %228, %v159_v56  }
 0x1b4   :  { %232 = vset.pattern.permute.xlu0 %v168_v38 }
 0x1b5   :  { %229 = vset.pattern.permute.xlu2 %v168_v38 }
 0x1bd   :  { %170 = vperm.xlu2 %229, %v159_v56  }
 0x207   :  { %v165_v57 = vpop.permute.xlu2 %164 }
 0x208   :  { %v185_v58 = vmul.f32 %v165_v57, %v335_v2  ;;  %v186_v59 = vmul.f32 %v165_v57, %v339_v4 }
 0x20a   :  { %193 = vst [vmem:[#allocation5] sm:$0xff] %v185_v58 }
 0x20b   :  { %194 = vst [vmem:[#allocation5 + $0x8] sm:$0xff] %v186_v59 }
 0x217   :  { %v171_v60 = vpop.permute.xlu2 %170 }
 0x218   :  { %v187_v61 = vmul.f32 %v171_v60, %v347_v8  ;;  %v188_v62 = vmul.f32 %v171_v60, %v349_v9 }
 0x21a   :  { %195 = vst [vmem:[#allocation5 + $0x10] sm:$0xff] %v187_v61 }
 0x21b   :  { %196 = vst [vmem:[#allocation5 + $0x18] sm:$0xff] %v188_v62 }
 0x21e   :  { %v184_v63 = vpop.permute.xlu1 %183  ;;  %v178_v3 = vpop.permute.xlu0 %177 }
 0x21f   :  { %v191_v5 = vmul.f32 %v184_v63, %v343_v6  ;;  %v192_v10 = vmul.f32 %v184_v63, %v345_v7  ;;  %v189_v11 = vmul.f32 %v178_v3, %v331_v0  ;;  %v190_v2 = vmul.f32 %v178_v3, %v333_v1 }
 0x221   :  { %199 = vst [vmem:[#allocation5 + $0x30] sm:$0xff] %v191_v5 }
 0x222   :  { %200 = vst [vmem:[#allocation5 + $0x38] sm:$0xff] %v192_v10 }
 0x223   :  { %197 = vst [vmem:[#allocation5 + $0x20] sm:$0xff] %v189_v11 }
 0x224   :  { %198 = vst [vmem:[#allocation5 + $0x28] sm:$0xff] %v190_v2 }
 0x225   :  { %213 = dma.vmem_to_hbm [thread:$0]  %s206_s3, 1024, %s208_s9, [#allocation4], %s292_s23, %s292_s23, %s293_s24  }
 0x226   :  { %289 = dma.done.wait [#allocation4], 1024  }
 0x227   :  { %290 = vsyncadd [#allocation4], 4294966272 }
 0x228   :  { %218 = vsyncpa [#allocation3], 1 }
 0x229   :  { %219 = vsyncpa [#allocation4], 1 }

</bundles_post_ra>
